<compile_context>
chip_gen: v6e
topology: v6e:2x2x1
jax: 0.10.0
libtpu: 0.0.40
codegen_flags: <defaults>
</compile_context>

<pallas_src>
import functools

import jax
import jax.numpy as jnp
from jax import lax
from jax.experimental import pallas as pl
from jax.experimental.pallas import tpu as pltpu

EPS = 1e-5   # PyTorch BatchNorm1d default
LANE = 128   # TPU lane width


def lstm_mlp_kernel(x_ref,                              # (T*B, D) time-major, flattened
                    wih_ref, whh_ref,                   # (D, 4H), (H, 4H)
                    bias_ref,                           # (1, 4H) = b_ih + b_hh
                    w1_ref, b1_ref, g1_ref, be1_ref,    # (H, Op), (1, Op) x3
                    w2_ref, b2_ref, g2_ref, be2_ref,    # (Op, Op), (1, Op) x3
                    out_ref,                            # (B, Op)
                    *, seq_len, batch):
    H = whh_ref.shape[0]
    f32 = jnp.float32

    # ---- hoisted input projection: one big MXU matmul, bias folded in once ----
    xp = (jnp.dot(x_ref[...], wih_ref[...], preferred_element_type=f32)
          + bias_ref[...])                              # (T*B, 4H)

    whh = whh_ref[...]

    # ---- LSTM recurrence: h, c live in vregs; fully unrolled over static T ----
    h = jnp.zeros((batch, H), f32)
    c = jnp.zeros((batch, H), f32)
    for t in range(seq_len):                            # T static & tiny -> full unroll
        gates = (xp[t * batch:(t + 1) * batch, :]       # static, tile-aligned slice
                 + jnp.dot(h, whh, preferred_element_type=f32))   # (B, 4H)
        i_g = jax.nn.sigmoid(gates[:, 0 * H:1 * H])
        f_g = jax.nn.sigmoid(gates[:, 1 * H:2 * H])
        g_g = jnp.tanh(gates[:, 2 * H:3 * H])
        o_g = jax.nn.sigmoid(gates[:, 3 * H:4 * H])
        c = f_g * c + i_g * g_g
        h = o_g * jnp.tanh(c)

    # ---- Linear1 + BatchNorm1d (batch stats) + ReLU (lane-dense Op columns) ----
    x1 = jnp.dot(h, w1_ref[...], preferred_element_type=f32) + b1_ref[...]
    m1 = jnp.mean(x1, axis=0, keepdims=True)
    v1 = jnp.mean((x1 - m1) * (x1 - m1), axis=0, keepdims=True)
    x1 = jnp.maximum((x1 - m1) * lax.rsqrt(v1 + EPS) * g1_ref[...] + be1_ref[...], 0.0)

    # ---- Linear2 + BatchNorm1d + ReLU ----
    x2 = jnp.dot(x1, w2_ref[...], preferred_element_type=f32) + b2_ref[...]
    m2 = jnp.mean(x2, axis=0, keepdims=True)
    v2 = jnp.mean((x2 - m2) * (x2 - m2), axis=0, keepdims=True)
    out_ref[...] = jnp.maximum(
        (x2 - m2) * lax.rsqrt(v2 + EPS) * g2_ref[...] + be2_ref[...], 0.0)


def mylstm_forward(x, params):
    """x: (B, T, D) float32 (batch_first, like the PyTorch module)."""
    B, T, D = x.shape
    H = params["w_hh"].shape[0]            # w_hh stored as (H, 4H)   <- bug fix
    O = params["w1"].shape[1]              # w1 stored as (H, O)
    Op = max(LANE, -(-O // LANE) * LANE)   # pad output features to lane width
    f32 = jnp.float32

    # Time-major + flatten: each timestep of the hoisted projection is then a
    # tile-aligned sublane block inside the kernel.  The transpose is one tiny
    # XLA op; the payoff is zero XLU shuffles on the serial recurrence path.
    x_flat = jnp.transpose(x, (1, 0, 2)).reshape(T * B, D)

    def pad_cols(a, n):
        return jnp.zeros((a.shape[0], n), f32).at[:, :a.shape[1]].set(a)

    bias = params["b_ih"] + params["b_hh"]      # fold the two LSTM biases once

    w1p, b1p, g1p, be1p = (pad_cols(params[k], Op) for k in ("w1", "b1", "g1", "be1"))
    w2p = jnp.zeros((Op, Op), f32).at[:O, :O].set(params["w2"])
    b2p, g2p, be2p = (pad_cols(params[k], Op) for k in ("b2", "g2", "be2"))

    args = (x_flat, params["w_ih"], params["w_hh"], bias,
            w1p, b1p, g1p, be1p, w2p, b2p, g2p, be2p)

    vmem = pl.BlockSpec(memory_space=pltpu.MemorySpace.VMEM)

    flops = int(2 * T * B * D * 4 * H          # hoisted input projection
                + 2 * T * B * H * 4 * H        # recurrent h @ W_hh matmuls
                + 2 * B * H * Op               # Linear1
                + 2 * B * Op * Op)             # Linear2
    transcendentals = int(5 * T * B * H + 2 * B * Op)
    bytes_accessed = int(sum(int(a.size) for a in args) * 4 + B * Op * 4)

    kernel = functools.partial(lstm_mlp_kernel, seq_len=T, batch=B)

    # At these toy sizes everything fits comfortably in VMEM in one grid-less
    # invocation.  At scale: add a batch-tile grid with
    # dimension_semantics=("parallel",) (2 TCs on v7x) and stream x over T via
    # a BlockSpec instead of one whole-array block.
    out_padded = pl.pallas_call(
        kernel,
        out_shape=jax.ShapeDtypeStruct((B, Op), f32),
        in_specs=[vmem] * len(args),
        out_specs=vmem,
        cost_estimate=pl.CostEstimate(flops=flops,
                                      transcendentals=transcendentals,
                                      bytes_accessed=bytes_accessed),
    )(*args)

    return out_padded[:, :O]


def init_params(key, input_dim, hidden_dim, output_dim):
    """Deterministic parameter init (PyTorch-style uniform ranges)."""
    ks = jax.random.split(key, 8)
    k_lstm = 1.0 / jnp.sqrt(hidden_dim)

    def u(k, shape, bound):
        return jax.random.uniform(k, shape, jnp.float32, -bound, bound)

    return {
        # stored pre-transposed for row @ W inside the kernel
        "w_ih": u(ks[0], (input_dim, 4 * hidden_dim), k_lstm),
        "w_hh": u(ks[1], (hidden_dim, 4 * hidden_dim), k_lstm),
        "b_ih": u(ks[2], (1, 4 * hidden_dim), k_lstm),
        "b_hh": u(ks[3], (1, 4 * hidden_dim), k_lstm),
        "w1":  u(ks[4], (hidden_dim, output_dim), 1.0 / jnp.sqrt(hidden_dim)),
        "b1":  u(ks[5], (1, output_dim), 1.0 / jnp.sqrt(hidden_dim)),
        "w2":  u(ks[6], (output_dim, output_dim), 1.0 / jnp.sqrt(output_dim)),
        "b2":  u(ks[7], (1, output_dim), 1.0 / jnp.sqrt(output_dim)),
        "g1":  jnp.ones((1, output_dim), jnp.float32),
        "be1": jnp.zeros((1, output_dim), jnp.float32),
        "g2":  jnp.ones((1, output_dim), jnp.float32),
        "be2": jnp.zeros((1, output_dim), jnp.float32),
    }


def reference_forward(x, p):
    """Pure-JAX reference of the same math (correctness check)."""
    B, T, D = x.shape
    H = p["w_hh"].shape[0]
    hp = lax.Precision.HIGHEST
    h = jnp.zeros((B, H), jnp.float32)
    c = jnp.zeros((B, H), jnp.float32)
    for t in range(T):
        gates = (jnp.dot(x[:, t, :], p["w_ih"], precision=hp)
                 + jnp.dot(h, p["w_hh"], precision=hp)
                 + p["b_ih"] + p["b_hh"])
        i_g = jax.nn.sigmoid(gates[:, 0 * H:1 * H])
        f_g = jax.nn.sigmoid(gates[:, 1 * H:2 * H])
        g_g = jnp.tanh(gates[:, 2 * H:3 * H])
        o_g = jax.nn.sigmoid(gates[:, 3 * H:4 * H])
        c = f_g * c + i_g * g_g
        h = o_g * jnp.tanh(c)

    def bn(v, g, b):
        m = jnp.mean(v, axis=0, keepdims=True)
        var = jnp.mean((v - m) ** 2, axis=0, keepdims=True)
        return (v - m) * lax.rsqrt(var + EPS) * g + b

    x1 = jnp.maximum(bn(jnp.dot(h, p["w1"], precision=hp) + p["b1"],
                        p["g1"], p["be1"]), 0.0)
    x2 = jnp.maximum(bn(jnp.dot(x1, p["w2"], precision=hp) + p["b2"],
                        p["g2"], p["be2"]), 0.0)
    return x2


if __name__ == "__main__":
    B, T, input_dim, hidden_dim, output_dim = 8, 8, 16, 32, 32

    key = jax.random.PRNGKey(0)
    k_x, k_p = jax.random.split(key)
    x = jax.random.normal(k_x, (B, T, input_dim), jnp.float32)
    params = init_params(k_p, input_dim, hidden_dim, output_dim)

    out = mylstm_forward(x, params)
    out = jax.block_until_ready(out)

    ref = reference_forward(x, params)
    assert out.shape == (B, output_dim)
    assert jnp.allclose(out, ref, atol=2e-3, rtol=2e-3)

    print("KERNEL_OK")
</pallas_src>

<mosaic_0001>
module attributes {stable_mosaic.version = 11 : i64} {
  func.func @lstm_mlp_kernel(%arg0: memref<64x16xf32, #tpu.memory_space<vmem>>, %arg1: memref<16x128xf32, #tpu.memory_space<vmem>>, %arg2: memref<32x128xf32, #tpu.memory_space<vmem>>, %arg3: memref<1x128xf32, #tpu.memory_space<vmem>>, %arg4: memref<32x128xf32, #tpu.memory_space<vmem>>, %arg5: memref<1x128xf32, #tpu.memory_space<vmem>>, %arg6: memref<1x128xf32, #tpu.memory_space<vmem>>, %arg7: memref<1x128xf32, #tpu.memory_space<vmem>>, %arg8: memref<128x128xf32, #tpu.memory_space<vmem>>, %arg9: memref<1x128xf32, #tpu.memory_space<vmem>>, %arg10: memref<1x128xf32, #tpu.memory_space<vmem>>, %arg11: memref<1x128xf32, #tpu.memory_space<vmem>>, %arg12: memref<8x128xf32, #tpu.memory_space<vmem>>) attributes {dimension_semantics = [], scalar_prefetch = 0 : i64, scratch_operands = 0 : i64, tpu.core_type = #tpu.core_type<tc>} {
    %c0 = arith.constant 0 : index
    %c0_0 = arith.constant 0 : index
    %0 = vector.load %arg0[%c0, %c0_0] : memref<64x16xf32, #tpu.memory_space<vmem>>, vector<64x16xf32>
    %c0_1 = arith.constant 0 : index
    %c0_2 = arith.constant 0 : index
    %1 = vector.load %arg1[%c0_1, %c0_2] : memref<16x128xf32, #tpu.memory_space<vmem>>, vector<16x128xf32>
    %cst = arith.constant dense<0.000000e+00> : vector<64x128xf32>
    %2 = tpu.matmul %0, %1, %cst {dimension_numbers = #tpu.dot_dimension_numbers<[1], [0], [0], [1], [0, 0, 1, 1], [], []>} : vector<64x16xf32>, vector<16x128xf32>, vector<64x128xf32> -> vector<64x128xf32>
    %c0_3 = arith.constant 0 : index
    %c0_4 = arith.constant 0 : index
    %3 = vector.load %arg3[%c0_3, %c0_4] : memref<1x128xf32, #tpu.memory_space<vmem>>, vector<1x128xf32>
    %4 = vector.broadcast %3 : vector<1x128xf32> to vector<64x128xf32>
    %5 = arith.addf %2, %4 : vector<64x128xf32>
    %c0_5 = arith.constant 0 : index
    %c0_6 = arith.constant 0 : index
    %6 = vector.load %arg2[%c0_5, %c0_6] : memref<32x128xf32, #tpu.memory_space<vmem>>, vector<32x128xf32>
    %cst_7 = arith.constant 0.000000e+00 : f32
    %7 = vector.broadcast %cst_7 : f32 to vector<8x32xf32>
    %cst_8 = arith.constant 0.000000e+00 : f32
    %8 = vector.broadcast %cst_8 : f32 to vector<8x32xf32>
    %9 = vector.extract_strided_slice %5 {offsets = [0, 0], sizes = [8, 128], strides = [1, 1]} : vector<64x128xf32> to vector<8x128xf32>
    %cst_9 = arith.constant dense<0.000000e+00> : vector<8x128xf32>
    %10 = tpu.matmul %7, %6, %cst_9 {dimension_numbers = #tpu.dot_dimension_numbers<[1], [0], [0], [1], [0, 0, 1, 1], [], []>} : vector<8x32xf32>, vector<32x128xf32>, vector<8x128xf32> -> vector<8x128xf32>
    %11 = arith.addf %9, %10 : vector<8x128xf32>
    %12 = vector.extract_strided_slice %11 {offsets = [0, 0], sizes = [8, 32], strides = [1, 1]} : vector<8x128xf32> to vector<8x32xf32>
    %13 = arith.negf %12 : vector<8x32xf32>
    %14 = math.exp %13 : vector<8x32xf32>
    %cst_10 = arith.constant 1.000000e+00 : f32
    %15 = vector.broadcast %cst_10 : f32 to vector<8x32xf32>
    %16 = arith.addf %15, %14 : vector<8x32xf32>
    %17 = arith.divf %15, %16 : vector<8x32xf32>
    %18 = vector.extract_strided_slice %11 {offsets = [0, 32], sizes = [8, 32], strides = [1, 1]} : vector<8x128xf32> to vector<8x32xf32>
    %19 = arith.negf %18 : vector<8x32xf32>
    %20 = math.exp %19 : vector<8x32xf32>
    %cst_11 = arith.constant 1.000000e+00 : f32
    %21 = vector.broadcast %cst_11 : f32 to vector<8x32xf32>
    %22 = arith.addf %21, %20 : vector<8x32xf32>
    %23 = arith.divf %21, %22 : vector<8x32xf32>
    %24 = vector.extract_strided_slice %11 {offsets = [0, 64], sizes = [8, 32], strides = [1, 1]} : vector<8x128xf32> to vector<8x32xf32>
    %25 = math.tanh %24 : vector<8x32xf32>
    %26 = vector.extract_strided_slice %11 {offsets = [0, 96], sizes = [8, 32], strides = [1, 1]} : vector<8x128xf32> to vector<8x32xf32>
    %27 = arith.negf %26 : vector<8x32xf32>
    %28 = math.exp %27 : vector<8x32xf32>
    %cst_12 = arith.constant 1.000000e+00 : f32
    %29 = vector.broadcast %cst_12 : f32 to vector<8x32xf32>
    %30 = arith.addf %29, %28 : vector<8x32xf32>
    %31 = arith.divf %29, %30 : vector<8x32xf32>
    %32 = arith.mulf %23, %8 : vector<8x32xf32>
    %33 = arith.mulf %17, %25 : vector<8x32xf32>
    %34 = arith.addf %32, %33 : vector<8x32xf32>
    %35 = math.tanh %34 : vector<8x32xf32>
    %36 = arith.mulf %31, %35 : vector<8x32xf32>
    %37 = vector.extract_strided_slice %5 {offsets = [8, 0], sizes = [8, 128], strides = [1, 1]} : vector<64x128xf32> to vector<8x128xf32>
    %cst_13 = arith.constant dense<0.000000e+00> : vector<8x128xf32>
    %38 = tpu.matmul %36, %6, %cst_13 {dimension_numbers = #tpu.dot_dimension_numbers<[1], [0], [0], [1], [0, 0, 1, 1], [], []>} : vector<8x32xf32>, vector<32x128xf32>, vector<8x128xf32> -> vector<8x128xf32>
    %39 = arith.addf %37, %38 : vector<8x128xf32>
    %40 = vector.extract_strided_slice %39 {offsets = [0, 0], sizes = [8, 32], strides = [1, 1]} : vector<8x128xf32> to vector<8x32xf32>
    %41 = arith.negf %40 : vector<8x32xf32>
    %42 = math.exp %41 : vector<8x32xf32>
    %cst_14 = arith.constant 1.000000e+00 : f32
    %43 = vector.broadcast %cst_14 : f32 to vector<8x32xf32>
    %44 = arith.addf %43, %42 : vector<8x32xf32>
    %45 = arith.divf %43, %44 : vector<8x32xf32>
    %46 = vector.extract_strided_slice %39 {offsets = [0, 32], sizes = [8, 32], strides = [1, 1]} : vector<8x128xf32> to vector<8x32xf32>
    %47 = arith.negf %46 : vector<8x32xf32>
    %48 = math.exp %47 : vector<8x32xf32>
    %cst_15 = arith.constant 1.000000e+00 : f32
    %49 = vector.broadcast %cst_15 : f32 to vector<8x32xf32>
    %50 = arith.addf %49, %48 : vector<8x32xf32>
    %51 = arith.divf %49, %50 : vector<8x32xf32>
    %52 = vector.extract_strided_slice %39 {offsets = [0, 64], sizes = [8, 32], strides = [1, 1]} : vector<8x128xf32> to vector<8x32xf32>
    %53 = math.tanh %52 : vector<8x32xf32>
    %54 = vector.extract_strided_slice %39 {offsets = [0, 96], sizes = [8, 32], strides = [1, 1]} : vector<8x128xf32> to vector<8x32xf32>
    %55 = arith.negf %54 : vector<8x32xf32>
    %56 = math.exp %55 : vector<8x32xf32>
    %cst_16 = arith.constant 1.000000e+00 : f32
    %57 = vector.broadcast %cst_16 : f32 to vector<8x32xf32>
    %58 = arith.addf %57, %56 : vector<8x32xf32>
    %59 = arith.divf %57, %58 : vector<8x32xf32>
    %60 = arith.mulf %51, %34 : vector<8x32xf32>
    %61 = arith.mulf %45, %53 : vector<8x32xf32>
    %62 = arith.addf %60, %61 : vector<8x32xf32>
    %63 = math.tanh %62 : vector<8x32xf32>
    %64 = arith.mulf %59, %63 : vector<8x32xf32>
    %65 = vector.extract_strided_slice %5 {offsets = [16, 0], sizes = [8, 128], strides = [1, 1]} : vector<64x128xf32> to vector<8x128xf32>
    %cst_17 = arith.constant dense<0.000000e+00> : vector<8x128xf32>
    %66 = tpu.matmul %64, %6, %cst_17 {dimension_numbers = #tpu.dot_dimension_numbers<[1], [0], [0], [1], [0, 0, 1, 1], [], []>} : vector<8x32xf32>, vector<32x128xf32>, vector<8x128xf32> -> vector<8x128xf32>
    %67 = arith.addf %65, %66 : vector<8x128xf32>
    %68 = vector.extract_strided_slice %67 {offsets = [0, 0], sizes = [8, 32], strides = [1, 1]} : vector<8x128xf32> to vector<8x32xf32>
    %69 = arith.negf %68 : vector<8x32xf32>
    %70 = math.exp %69 : vector<8x32xf32>
    %cst_18 = arith.constant 1.000000e+00 : f32
    %71 = vector.broadcast %cst_18 : f32 to vector<8x32xf32>
    %72 = arith.addf %71, %70 : vector<8x32xf32>
    %73 = arith.divf %71, %72 : vector<8x32xf32>
    %74 = vector.extract_strided_slice %67 {offsets = [0, 32], sizes = [8, 32], strides = [1, 1]} : vector<8x128xf32> to vector<8x32xf32>
    %75 = arith.negf %74 : vector<8x32xf32>
    %76 = math.exp %75 : vector<8x32xf32>
    %cst_19 = arith.constant 1.000000e+00 : f32
    %77 = vector.broadcast %cst_19 : f32 to vector<8x32xf32>
    %78 = arith.addf %77, %76 : vector<8x32xf32>
    %79 = arith.divf %77, %78 : vector<8x32xf32>
    %80 = vector.extract_strided_slice %67 {offsets = [0, 64], sizes = [8, 32], strides = [1, 1]} : vector<8x128xf32> to vector<8x32xf32>
    %81 = math.tanh %80 : vector<8x32xf32>
    %82 = vector.extract_strided_slice %67 {offsets = [0, 96], sizes = [8, 32], strides = [1, 1]} : vector<8x128xf32> to vector<8x32xf32>
    %83 = arith.negf %82 : vector<8x32xf32>
    %84 = math.exp %83 : vector<8x32xf32>
    %cst_20 = arith.constant 1.000000e+00 : f32
    %85 = vector.broadcast %cst_20 : f32 to vector<8x32xf32>
    %86 = arith.addf %85, %84 : vector<8x32xf32>
    %87 = arith.divf %85, %86 : vector<8x32xf32>
    %88 = arith.mulf %79, %62 : vector<8x32xf32>
    %89 = arith.mulf %73, %81 : vector<8x32xf32>
    %90 = arith.addf %88, %89 : vector<8x32xf32>
    %91 = math.tanh %90 : vector<8x32xf32>
    %92 = arith.mulf %87, %91 : vector<8x32xf32>
    %93 = vector.extract_strided_slice %5 {offsets = [24, 0], sizes = [8, 128], strides = [1, 1]} : vector<64x128xf32> to vector<8x128xf32>
    %cst_21 = arith.constant dense<0.000000e+00> : vector<8x128xf32>
    %94 = tpu.matmul %92, %6, %cst_21 {dimension_numbers = #tpu.dot_dimension_numbers<[1], [0], [0], [1], [0, 0, 1, 1], [], []>} : vector<8x32xf32>, vector<32x128xf32>, vector<8x128xf32> -> vector<8x128xf32>
    %95 = arith.addf %93, %94 : vector<8x128xf32>
    %96 = vector.extract_strided_slice %95 {offsets = [0, 0], sizes = [8, 32], strides = [1, 1]} : vector<8x128xf32> to vector<8x32xf32>
    %97 = arith.negf %96 : vector<8x32xf32>
    %98 = math.exp %97 : vector<8x32xf32>
    %cst_22 = arith.constant 1.000000e+00 : f32
    %99 = vector.broadcast %cst_22 : f32 to vector<8x32xf32>
    %100 = arith.addf %99, %98 : vector<8x32xf32>
    %101 = arith.divf %99, %100 : vector<8x32xf32>
    %102 = vector.extract_strided_slice %95 {offsets = [0, 32], sizes = [8, 32], strides = [1, 1]} : vector<8x128xf32> to vector<8x32xf32>
    %103 = arith.negf %102 : vector<8x32xf32>
    %104 = math.exp %103 : vector<8x32xf32>
    %cst_23 = arith.constant 1.000000e+00 : f32
    %105 = vector.broadcast %cst_23 : f32 to vector<8x32xf32>
    %106 = arith.addf %105, %104 : vector<8x32xf32>
    %107 = arith.divf %105, %106 : vector<8x32xf32>
    %108 = vector.extract_strided_slice %95 {offsets = [0, 64], sizes = [8, 32], strides = [1, 1]} : vector<8x128xf32> to vector<8x32xf32>
    %109 = math.tanh %108 : vector<8x32xf32>
    %110 = vector.extract_strided_slice %95 {offsets = [0, 96], sizes = [8, 32], strides = [1, 1]} : vector<8x128xf32> to vector<8x32xf32>
    %111 = arith.negf %110 : vector<8x32xf32>
    %112 = math.exp %111 : vector<8x32xf32>
    %cst_24 = arith.constant 1.000000e+00 : f32
    %113 = vector.broadcast %cst_24 : f32 to vector<8x32xf32>
    %114 = arith.addf %113, %112 : vector<8x32xf32>
    %115 = arith.divf %113, %114 : vector<8x32xf32>
    %116 = arith.mulf %107, %90 : vector<8x32xf32>
    %117 = arith.mulf %101, %109 : vector<8x32xf32>
    %118 = arith.addf %116, %117 : vector<8x32xf32>
    %119 = math.tanh %118 : vector<8x32xf32>
    %120 = arith.mulf %115, %119 : vector<8x32xf32>
    %121 = vector.extract_strided_slice %5 {offsets = [32, 0], sizes = [8, 128], strides = [1, 1]} : vector<64x128xf32> to vector<8x128xf32>
    %cst_25 = arith.constant dense<0.000000e+00> : vector<8x128xf32>
    %122 = tpu.matmul %120, %6, %cst_25 {dimension_numbers = #tpu.dot_dimension_numbers<[1], [0], [0], [1], [0, 0, 1, 1], [], []>} : vector<8x32xf32>, vector<32x128xf32>, vector<8x128xf32> -> vector<8x128xf32>
    %123 = arith.addf %121, %122 : vector<8x128xf32>
    %124 = vector.extract_strided_slice %123 {offsets = [0, 0], sizes = [8, 32], strides = [1, 1]} : vector<8x128xf32> to vector<8x32xf32>
    %125 = arith.negf %124 : vector<8x32xf32>
    %126 = math.exp %125 : vector<8x32xf32>
    %cst_26 = arith.constant 1.000000e+00 : f32
    %127 = vector.broadcast %cst_26 : f32 to vector<8x32xf32>
    %128 = arith.addf %127, %126 : vector<8x32xf32>
    %129 = arith.divf %127, %128 : vector<8x32xf32>
    %130 = vector.extract_strided_slice %123 {offsets = [0, 32], sizes = [8, 32], strides = [1, 1]} : vector<8x128xf32> to vector<8x32xf32>
    %131 = arith.negf %130 : vector<8x32xf32>
    %132 = math.exp %131 : vector<8x32xf32>
    %cst_27 = arith.constant 1.000000e+00 : f32
    %133 = vector.broadcast %cst_27 : f32 to vector<8x32xf32>
    %134 = arith.addf %133, %132 : vector<8x32xf32>
    %135 = arith.divf %133, %134 : vector<8x32xf32>
    %136 = vector.extract_strided_slice %123 {offsets = [0, 64], sizes = [8, 32], strides = [1, 1]} : vector<8x128xf32> to vector<8x32xf32>
    %137 = math.tanh %136 : vector<8x32xf32>
    %138 = vector.extract_strided_slice %123 {offsets = [0, 96], sizes = [8, 32], strides = [1, 1]} : vector<8x128xf32> to vector<8x32xf32>
    %139 = arith.negf %138 : vector<8x32xf32>
    %140 = math.exp %139 : vector<8x32xf32>
    %cst_28 = arith.constant 1.000000e+00 : f32
    %141 = vector.broadcast %cst_28 : f32 to vector<8x32xf32>
    %142 = arith.addf %141, %140 : vector<8x32xf32>
    %143 = arith.divf %141, %142 : vector<8x32xf32>
    %144 = arith.mulf %135, %118 : vector<8x32xf32>
    %145 = arith.mulf %129, %137 : vector<8x32xf32>
    %146 = arith.addf %144, %145 : vector<8x32xf32>
    %147 = math.tanh %146 : vector<8x32xf32>
    %148 = arith.mulf %143, %147 : vector<8x32xf32>
    %149 = vector.extract_strided_slice %5 {offsets = [40, 0], sizes = [8, 128], strides = [1, 1]} : vector<64x128xf32> to vector<8x128xf32>
    %cst_29 = arith.constant dense<0.000000e+00> : vector<8x128xf32>
    %150 = tpu.matmul %148, %6, %cst_29 {dimension_numbers = #tpu.dot_dimension_numbers<[1], [0], [0], [1], [0, 0, 1, 1], [], []>} : vector<8x32xf32>, vector<32x128xf32>, vector<8x128xf32> -> vector<8x128xf32>
    %151 = arith.addf %149, %150 : vector<8x128xf32>
    %152 = vector.extract_strided_slice %151 {offsets = [0, 0], sizes = [8, 32], strides = [1, 1]} : vector<8x128xf32> to vector<8x32xf32>
    %153 = arith.negf %152 : vector<8x32xf32>
    %154 = math.exp %153 : vector<8x32xf32>
    %cst_30 = arith.constant 1.000000e+00 : f32
    %155 = vector.broadcast %cst_30 : f32 to vector<8x32xf32>
    %156 = arith.addf %155, %154 : vector<8x32xf32>
    %157 = arith.divf %155, %156 : vector<8x32xf32>
    %158 = vector.extract_strided_slice %151 {offsets = [0, 32], sizes = [8, 32], strides = [1, 1]} : vector<8x128xf32> to vector<8x32xf32>
    %159 = arith.negf %158 : vector<8x32xf32>
    %160 = math.exp %159 : vector<8x32xf32>
    %cst_31 = arith.constant 1.000000e+00 : f32
    %161 = vector.broadcast %cst_31 : f32 to vector<8x32xf32>
    %162 = arith.addf %161, %160 : vector<8x32xf32>
    %163 = arith.divf %161, %162 : vector<8x32xf32>
    %164 = vector.extract_strided_slice %151 {offsets = [0, 64], sizes = [8, 32], strides = [1, 1]} : vector<8x128xf32> to vector<8x32xf32>
    %165 = math.tanh %164 : vector<8x32xf32>
    %166 = vector.extract_strided_slice %151 {offsets = [0, 96], sizes = [8, 32], strides = [1, 1]} : vector<8x128xf32> to vector<8x32xf32>
    %167 = arith.negf %166 : vector<8x32xf32>
    %168 = math.exp %167 : vector<8x32xf32>
    %cst_32 = arith.constant 1.000000e+00 : f32
    %169 = vector.broadcast %cst_32 : f32 to vector<8x32xf32>
    %170 = arith.addf %169, %168 : vector<8x32xf32>
    %171 = arith.divf %169, %170 : vector<8x32xf32>
    %172 = arith.mulf %163, %146 : vector<8x32xf32>
    %173 = arith.mulf %157, %165 : vector<8x32xf32>
    %174 = arith.addf %172, %173 : vector<8x32xf32>
    %175 = math.tanh %174 : vector<8x32xf32>
    %176 = arith.mulf %171, %175 : vector<8x32xf32>
    %177 = vector.extract_strided_slice %5 {offsets = [48, 0], sizes = [8, 128], strides = [1, 1]} : vector<64x128xf32> to vector<8x128xf32>
    %cst_33 = arith.constant dense<0.000000e+00> : vector<8x128xf32>
    %178 = tpu.matmul %176, %6, %cst_33 {dimension_numbers = #tpu.dot_dimension_numbers<[1], [0], [0], [1], [0, 0, 1, 1], [], []>} : vector<8x32xf32>, vector<32x128xf32>, vector<8x128xf32> -> vector<8x128xf32>
    %179 = arith.addf %177, %178 : vector<8x128xf32>
    %180 = vector.extract_strided_slice %179 {offsets = [0, 0], sizes = [8, 32], strides = [1, 1]} : vector<8x128xf32> to vector<8x32xf32>
    %181 = arith.negf %180 : vector<8x32xf32>
    %182 = math.exp %181 : vector<8x32xf32>
    %cst_34 = arith.constant 1.000000e+00 : f32
    %183 = vector.broadcast %cst_34 : f32 to vector<8x32xf32>
    %184 = arith.addf %183, %182 : vector<8x32xf32>
    %185 = arith.divf %183, %184 : vector<8x32xf32>
    %186 = vector.extract_strided_slice %179 {offsets = [0, 32], sizes = [8, 32], strides = [1, 1]} : vector<8x128xf32> to vector<8x32xf32>
    %187 = arith.negf %186 : vector<8x32xf32>
    %188 = math.exp %187 : vector<8x32xf32>
    %cst_35 = arith.constant 1.000000e+00 : f32
    %189 = vector.broadcast %cst_35 : f32 to vector<8x32xf32>
    %190 = arith.addf %189, %188 : vector<8x32xf32>
    %191 = arith.divf %189, %190 : vector<8x32xf32>
    %192 = vector.extract_strided_slice %179 {offsets = [0, 64], sizes = [8, 32], strides = [1, 1]} : vector<8x128xf32> to vector<8x32xf32>
    %193 = math.tanh %192 : vector<8x32xf32>
    %194 = vector.extract_strided_slice %179 {offsets = [0, 96], sizes = [8, 32], strides = [1, 1]} : vector<8x128xf32> to vector<8x32xf32>
    %195 = arith.negf %194 : vector<8x32xf32>
    %196 = math.exp %195 : vector<8x32xf32>
    %cst_36 = arith.constant 1.000000e+00 : f32
    %197 = vector.broadcast %cst_36 : f32 to vector<8x32xf32>
    %198 = arith.addf %197, %196 : vector<8x32xf32>
    %199 = arith.divf %197, %198 : vector<8x32xf32>
    %200 = arith.mulf %191, %174 : vector<8x32xf32>
    %201 = arith.mulf %185, %193 : vector<8x32xf32>
    %202 = arith.addf %200, %201 : vector<8x32xf32>
    %203 = math.tanh %202 : vector<8x32xf32>
    %204 = arith.mulf %199, %203 : vector<8x32xf32>
    %205 = vector.extract_strided_slice %5 {offsets = [56, 0], sizes = [8, 128], strides = [1, 1]} : vector<64x128xf32> to vector<8x128xf32>
    %cst_37 = arith.constant dense<0.000000e+00> : vector<8x128xf32>
    %206 = tpu.matmul %204, %6, %cst_37 {dimension_numbers = #tpu.dot_dimension_numbers<[1], [0], [0], [1], [0, 0, 1, 1], [], []>} : vector<8x32xf32>, vector<32x128xf32>, vector<8x128xf32> -> vector<8x128xf32>
    %207 = arith.addf %205, %206 : vector<8x128xf32>
    %208 = vector.extract_strided_slice %207 {offsets = [0, 0], sizes = [8, 32], strides = [1, 1]} : vector<8x128xf32> to vector<8x32xf32>
    %209 = arith.negf %208 : vector<8x32xf32>
    %210 = math.exp %209 : vector<8x32xf32>
    %cst_38 = arith.constant 1.000000e+00 : f32
    %211 = vector.broadcast %cst_38 : f32 to vector<8x32xf32>
    %212 = arith.addf %211, %210 : vector<8x32xf32>
    %213 = arith.divf %211, %212 : vector<8x32xf32>
    %214 = vector.extract_strided_slice %207 {offsets = [0, 32], sizes = [8, 32], strides = [1, 1]} : vector<8x128xf32> to vector<8x32xf32>
    %215 = arith.negf %214 : vector<8x32xf32>
    %216 = math.exp %215 : vector<8x32xf32>
    %cst_39 = arith.constant 1.000000e+00 : f32
    %217 = vector.broadcast %cst_39 : f32 to vector<8x32xf32>
    %218 = arith.addf %217, %216 : vector<8x32xf32>
    %219 = arith.divf %217, %218 : vector<8x32xf32>
    %220 = vector.extract_strided_slice %207 {offsets = [0, 64], sizes = [8, 32], strides = [1, 1]} : vector<8x128xf32> to vector<8x32xf32>
    %221 = math.tanh %220 : vector<8x32xf32>
    %222 = vector.extract_strided_slice %207 {offsets = [0, 96], sizes = [8, 32], strides = [1, 1]} : vector<8x128xf32> to vector<8x32xf32>
    %223 = arith.negf %222 : vector<8x32xf32>
    %224 = math.exp %223 : vector<8x32xf32>
    %cst_40 = arith.constant 1.000000e+00 : f32
    %225 = vector.broadcast %cst_40 : f32 to vector<8x32xf32>
    %226 = arith.addf %225, %224 : vector<8x32xf32>
    %227 = arith.divf %225, %226 : vector<8x32xf32>
    %228 = arith.mulf %219, %202 : vector<8x32xf32>
    %229 = arith.mulf %213, %221 : vector<8x32xf32>
    %230 = arith.addf %228, %229 : vector<8x32xf32>
    %231 = math.tanh %230 : vector<8x32xf32>
    %232 = arith.mulf %227, %231 : vector<8x32xf32>
    %c0_41 = arith.constant 0 : index
    %c0_42 = arith.constant 0 : index
    %233 = vector.load %arg4[%c0_41, %c0_42] : memref<32x128xf32, #tpu.memory_space<vmem>>, vector<32x128xf32>
    %cst_43 = arith.constant dense<0.000000e+00> : vector<8x128xf32>
    %234 = tpu.matmul %232, %233, %cst_43 {dimension_numbers = #tpu.dot_dimension_numbers<[1], [0], [0], [1], [0, 0, 1, 1], [], []>} : vector<8x32xf32>, vector<32x128xf32>, vector<8x128xf32> -> vector<8x128xf32>
    %c0_44 = arith.constant 0 : index
    %c0_45 = arith.constant 0 : index
    %235 = vector.load %arg5[%c0_44, %c0_45] : memref<1x128xf32, #tpu.memory_space<vmem>>, vector<1x128xf32>
    %236 = vector.broadcast %235 : vector<1x128xf32> to vector<8x128xf32>
    %237 = arith.addf %234, %236 : vector<8x128xf32>
    %cst_46 = arith.constant dense<0.000000e+00> : vector<128xf32>
    %238 = vector.multi_reduction <add>, %237, %cst_46 [0] : vector<8x128xf32> to vector<128xf32>
    %239 = vector.shape_cast %238 : vector<128xf32> to vector<1x128xf32>
    %cst_47 = arith.constant 8.000000e+00 : f32
    %240 = vector.broadcast %cst_47 : f32 to vector<1x128xf32>
    %241 = arith.divf %239, %240 : vector<1x128xf32>
    %242 = vector.broadcast %241 : vector<1x128xf32> to vector<8x128xf32>
    %243 = arith.subf %237, %242 : vector<8x128xf32>
    %244 = vector.broadcast %241 : vector<1x128xf32> to vector<8x128xf32>
    %245 = arith.subf %237, %244 : vector<8x128xf32>
    %246 = arith.mulf %243, %245 : vector<8x128xf32>
    %cst_48 = arith.constant dense<0.000000e+00> : vector<128xf32>
    %247 = vector.multi_reduction <add>, %246, %cst_48 [0] : vector<8x128xf32> to vector<128xf32>
    %248 = vector.shape_cast %247 : vector<128xf32> to vector<1x128xf32>
    %cst_49 = arith.constant 8.000000e+00 : f32
    %249 = vector.broadcast %cst_49 : f32 to vector<1x128xf32>
    %250 = arith.divf %248, %249 : vector<1x128xf32>
    %251 = vector.broadcast %241 : vector<1x128xf32> to vector<8x128xf32>
    %252 = arith.subf %237, %251 : vector<8x128xf32>
    %cst_50 = arith.constant 9.99999974E-6 : f32
    %253 = vector.broadcast %cst_50 : f32 to vector<1x128xf32>
    %254 = arith.addf %250, %253 : vector<1x128xf32>
    %255 = math.rsqrt %254 : vector<1x128xf32>
    %256 = vector.broadcast %255 : vector<1x128xf32> to vector<8x128xf32>
    %257 = arith.mulf %252, %256 : vector<8x128xf32>
    %c0_51 = arith.constant 0 : index
    %c0_52 = arith.constant 0 : index
    %258 = vector.load %arg6[%c0_51, %c0_52] : memref<1x128xf32, #tpu.memory_space<vmem>>, vector<1x128xf32>
    %259 = vector.broadcast %258 : vector<1x128xf32> to vector<8x128xf32>
    %260 = arith.mulf %257, %259 : vector<8x128xf32>
    %c0_53 = arith.constant 0 : index
    %c0_54 = arith.constant 0 : index
    %261 = vector.load %arg7[%c0_53, %c0_54] : memref<1x128xf32, #tpu.memory_space<vmem>>, vector<1x128xf32>
    %262 = vector.broadcast %261 : vector<1x128xf32> to vector<8x128xf32>
    %263 = arith.addf %260, %262 : vector<8x128xf32>
    %cst_55 = arith.constant 0.000000e+00 : f32
    %264 = vector.broadcast %cst_55 : f32 to vector<8x128xf32>
    %265 = arith.maximumf %263, %264 : vector<8x128xf32>
    %c0_56 = arith.constant 0 : index
    %c0_57 = arith.constant 0 : index
    %266 = vector.load %arg8[%c0_56, %c0_57] : memref<128x128xf32, #tpu.memory_space<vmem>>, vector<128x128xf32>
    %cst_58 = arith.constant dense<0.000000e+00> : vector<8x128xf32>
    %267 = tpu.matmul %265, %266, %cst_58 {dimension_numbers = #tpu.dot_dimension_numbers<[1], [0], [0], [1], [0, 0, 1, 1], [], []>} : vector<8x128xf32>, vector<128x128xf32>, vector<8x128xf32> -> vector<8x128xf32>
    %c0_59 = arith.constant 0 : index
    %c0_60 = arith.constant 0 : index
    %268 = vector.load %arg9[%c0_59, %c0_60] : memref<1x128xf32, #tpu.memory_space<vmem>>, vector<1x128xf32>
    %269 = vector.broadcast %268 : vector<1x128xf32> to vector<8x128xf32>
    %270 = arith.addf %267, %269 : vector<8x128xf32>
    %cst_61 = arith.constant dense<0.000000e+00> : vector<128xf32>
    %271 = vector.multi_reduction <add>, %270, %cst_61 [0] : vector<8x128xf32> to vector<128xf32>
    %272 = vector.shape_cast %271 : vector<128xf32> to vector<1x128xf32>
    %cst_62 = arith.constant 8.000000e+00 : f32
    %273 = vector.broadcast %cst_62 : f32 to vector<1x128xf32>
    %274 = arith.divf %272, %273 : vector<1x128xf32>
    %275 = vector.broadcast %274 : vector<1x128xf32> to vector<8x128xf32>
    %276 = arith.subf %270, %275 : vector<8x128xf32>
    %277 = vector.broadcast %274 : vector<1x128xf32> to vector<8x128xf32>
    %278 = arith.subf %270, %277 : vector<8x128xf32>
    %279 = arith.mulf %276, %278 : vector<8x128xf32>
    %cst_63 = arith.constant dense<0.000000e+00> : vector<128xf32>
    %280 = vector.multi_reduction <add>, %279, %cst_63 [0] : vector<8x128xf32> to vector<128xf32>
    %281 = vector.shape_cast %280 : vector<128xf32> to vector<1x128xf32>
    %cst_64 = arith.constant 8.000000e+00 : f32
    %282 = vector.broadcast %cst_64 : f32 to vector<1x128xf32>
    %283 = arith.divf %281, %282 : vector<1x128xf32>
    %284 = vector.broadcast %274 : vector<1x128xf32> to vector<8x128xf32>
    %285 = arith.subf %270, %284 : vector<8x128xf32>
    %cst_65 = arith.constant 9.99999974E-6 : f32
    %286 = vector.broadcast %cst_65 : f32 to vector<1x128xf32>
    %287 = arith.addf %283, %286 : vector<1x128xf32>
    %288 = math.rsqrt %287 : vector<1x128xf32>
    %289 = vector.broadcast %288 : vector<1x128xf32> to vector<8x128xf32>
    %290 = arith.mulf %285, %289 : vector<8x128xf32>
    %c0_66 = arith.constant 0 : index
    %c0_67 = arith.constant 0 : index
    %291 = vector.load %arg10[%c0_66, %c0_67] : memref<1x128xf32, #tpu.memory_space<vmem>>, vector<1x128xf32>
    %292 = vector.broadcast %291 : vector<1x128xf32> to vector<8x128xf32>
    %293 = arith.mulf %290, %292 : vector<8x128xf32>
    %c0_68 = arith.constant 0 : index
    %c0_69 = arith.constant 0 : index
    %294 = vector.load %arg11[%c0_68, %c0_69] : memref<1x128xf32, #tpu.memory_space<vmem>>, vector<1x128xf32>
    %295 = vector.broadcast %294 : vector<1x128xf32> to vector<8x128xf32>
    %296 = arith.addf %293, %295 : vector<8x128xf32>
    %cst_70 = arith.constant 0.000000e+00 : f32
    %297 = vector.broadcast %cst_70 : f32 to vector<8x128xf32>
    %298 = arith.maximumf %296, %297 : vector<8x128xf32>
    %c0_71 = arith.constant 0 : index
    %c0_72 = arith.constant 0 : index
    %299 = vector.load %arg12[%c0_71, %c0_72] : memref<8x128xf32, #tpu.memory_space<vmem>>, vector<8x128xf32>
    tpu.vector_store %arg12[%c0_71, %c0_72], %298 {strides = array<i32>} : memref<8x128xf32, #tpu.memory_space<vmem>>, vector<8x128xf32>,
    return
  }
}

</mosaic_0001>

<bundles_post_ra>
// kernel: tpu_custom_call.1
= control target key start
LH: loop header
LB: loop body
LE: loop exit
PB: predicated region body
PF: predicated region fallthrough
CT: control target
= control target key end

     0   :  { %17 = vsyncpa [#allocation3], 0  ;;  %s1980_s0 = inlined_call_operand.vmem [shape: f32[64,16], index: 0, kind: input, shape index: {}]   ;;  %s1981_s1 = inlined_call_operand.vmem [shape: f32[16,128], index: 1, kind: input, shape index: {}]   ;;  %s1982_s2 = inlined_call_operand.vmem [shape: f32[32,128], index: 2, kind: input, shape index: {}]   ;;  %s1983_s3 = inlined_call_operand.vmem [shape: f32[1,128], index: 3, kind: input, shape index: {}]   ;;  %s1984_s4 = inlined_call_operand.vmem [shape: f32[32,128], index: 4, kind: input, shape index: {}]   ;;  %s1985_s5 = inlined_call_operand.vmem [shape: f32[1,128], index: 5, kind: input, shape index: {}]   ;;  %s1986_s6 = inlined_call_operand.vmem [shape: f32[1,128], index: 6, kind: input, shape index: {}]   ;;  %s1987_s7 = inlined_call_operand.vmem [shape: f32[1,128], index: 7, kind: input, shape index: {}]   ;;  %s1988_s8 = inlined_call_operand.hbm [shape: f32[128,128], index: 8, kind: input, shape index: {}]   ;;  %s1989_s9 = inlined_call_operand.vmem [shape: f32[1,128], index: 9, kind: input, shape index: {}]   ;;  %s1990_s10 = inlined_call_operand.vmem [shape: f32[1,128], index: 10, kind: input, shape index: {}]   ;;  %s1991_s11 = inlined_call_operand.vmem [shape: f32[1,128], index: 11, kind: input, shape index: {}]   ;;  %s1992_s12 = inlined_call_operand.hbm [shape: f32[8,128], index: 12, kind: output, shape index: {}]  }
   0x1   :  { %18 = vsyncpa [#allocation4], 0  ;;  %s1647_s21 = smov [#allocation2]  }
   0x2   :  { %s40_s22 = sshll.u32 %s1647_s21, 4  ;;  %s41_s22 = int_to_ptr.vmem [resolvable:$true] %s40_s22 }
   0x3   :  { %s1611_s23 = scalar_lea.vmem %s41_s22, 2048  ;;  %p1616_p1 = scmp.lt.s32.totalorder %s41_s22, %s41_s22 }
   0x4   :  { %p1612_p0 = scmp.ne.s32.totalorder %s41_s22, %s1611_s23  ;;  %p1617_p2 = scmp.lt.s32.totalorder %s1611_s23, %s1611_s23 }
   0x6   :  { %p1618_p3 = por %p1617_p2, %p1616_p1 }
   0x8   :  { %p1619_p4 = pnand %p1618_p3, %p1612_p0 }
   0xa   :  { %1622 = shalt.err (!%p1619_p4)
}
   0xb   :  { %s1648_s24 = smov 128   ;;  %s1649_s25 = smov 8  }
   0xc   :  { %46 = dma.hbm_to_vmem [thread:$0]  %s1988_s8, 2048, %s41_s22, [#allocation3], %s1648_s24, %s1648_s24, %s1649_s25  }
   0xd   :  { %1643 = dma.done.wait [#allocation3], 2048  }
   0xe   :  { %1644 = vsyncadd [#allocation3], 4294965248  ;;  %v1650_v0 = vmov 0.0   ;;  %vm1651_vm0 = vmmov 0   ;;  %vm73_vm1 = vcmask 130048   ;;  %v65_v1 = vld [vmem:[%s1981_s1 + $0x8] sm:$0xff] }
   0xf   :  { %1426 = vmatprep.subr.mxu1 %v1650_v0  ;;  %1434 = vmatprep.mubr.msk.f32.mxu1 %vm1651_vm0, %v1650_v0  ;;  %v64_v2 = vld [vmem:[%s1981_s1] sm:$0xff]  ;;  %v1739_v4 = vld [vmem:[%s1982_s2 + $0x18] sm:$0xff]  ;;  %v57_v5 = vld [vmem:[%s1980_s0 + $0x8] sm:$0xff]  ;;  %s1653_s17 = smov 32   ;;  %vm207_vm2 = vcmask 261120   ;;  %s1654_s14 = smov [#allocation5]  }
  0x10   :  { %v56_v3 = vld [vmem:[%s1980_s0] sm:$0xff]  ;;  %1377 = vmatprep.subr.mxu0 %v65_v1  ;;  %1427 = vmatpush3.msra.mxu1 %v1739_v4  ;;  %v58_v6 = vld [vmem:[%s1980_s0 + $0x10] sm:$0xff]  ;;  %v59_v8 = vld [vmem:[%s1980_s0 + $0x18] sm:$0xff]  ;;  %s1265_s8 = sshll.u32 %s1654_s14, 4  ;;  %s1266_s8 = int_to_ptr.vmem [resolvable:$true] %s1265_s8 }
  0x11   :  { %1381 = vmatprep.mubr.msk.f32.mxu0 %vm73_vm1, %v56_v3  ;;  %1378 = vmatpush3.msra.mxu0 %v65_v1  ;;  %v1751_v7 = vld [vmem:[%s1982_s2 + $0x10] sm:$0xff]  ;;  %v60_v9 = vld [vmem:[%s1980_s0 + $0x20] sm:$0xff]  ;;  %v1769_v10 = vld [vmem:[%s1982_s2 + $0x8] sm:$0xff]  ;;  %p1628_p6 = scmp.lt.s32.totalorder %s1266_s8, %s1266_s8 }
  0x12   :  { %1379 = vmatprep.subr.mxu0 %v64_v2  ;;  %1428 = vmatprep.subr.mxu1 %v1650_v0  ;;  %v1779_v11 = vld [vmem:[%s1982_s2] sm:$0xff]  ;;  %v61_v12 = vld [vmem:[%s1980_s0 + $0x28] sm:$0xff]  ;;  %v62_v13 = vld [vmem:[%s1980_s0 + $0x30] sm:$0xff]  ;;  %s1623_s2 = scalar_lea.vmem %s1266_s8, 128 }
  0x13   :  { %1380 = vmatpush3.msra.mxu0 %v64_v2  ;;  %1429 = vmatpush3.msra.mxu1 %v1751_v7  ;;  %v63_v14 = vld [vmem:[%s1980_s0 + $0x38] sm:$0xff]  ;;  %v1274_v15 = vld [vmem:[%s1983_s3] ss:$0 sm:$0xff]  ;;  %s1652_s3 = smov 64   ;;  %p1624_p5 = scmp.ne.s32.totalorder %s1266_s8, %s1623_s2 }
  0x14   :  { %1382 = vmatmul.mubr.msk.f32.vlgmr.msra.gmra.mxu0 %vm73_vm1, %v57_v5  ;;  %1393 = vmatprep.subr.mxu0 %v1650_v0  ;;  %p1629_p7 = scmp.lt.s32.totalorder %s1623_s2, %s1623_s2 }
  0x15   :  { %1394 = vmatpush3.msra.mxu0 %v1739_v4  ;;  %1384 = vmatprep.mubr.msk.f32.mxu0 %vm73_vm1, %v58_v6 }
  0x16   :  { %1395 = vmatprep.subr.mxu0 %v1650_v0  ;;  %1430 = vmatprep.subr.mxu1 %v1650_v0  ;;  %p1630_p8 = por %p1629_p7, %p1628_p6 }
  0x17   :  { %1396 = vmatpush3.msra.mxu0 %v1751_v7  ;;  %1431 = vmatpush3.msra.mxu1 %v1769_v10 }
  0x18   :  { %1385 = vmatmul.mubr.msk.f32.gmra.mxu0 %vm73_vm1, %v59_v8  ;;  %1397 = vmatprep.subr.mxu0 %v1650_v0  ;;  %p1631_p9 = pnand %p1630_p8, %p1624_p5 }
  0x19   :  { %1387 = vmatprep.mubr.msk.f32.mxu0 %vm73_vm1, %v60_v9  ;;  %1398 = vmatpush3.msra.mxu0 %v1769_v10 }
  0x1a   :  { %1399 = vmatprep.subr.mxu0 %v1650_v0  ;;  %1432 = vmatprep.subr.mxu1 %v1650_v0 }
  0x1b   :  { %1400 = vmatpush3.msra.mxu0 %v1779_v11  ;;  %1433 = vmatpush3.msra.mxu1 %v1779_v11 }
  0x1c   :  { %1388 = vmatmul.mubr.msk.f32.gmra.mxu0 %vm73_vm1, %v61_v12  ;;  %1404 = vmatprep.subr.mxu0 %v1650_v0 }
  0x1d   :  { %1390 = vmatprep.mubr.msk.f32.mxu0 %vm73_vm1, %v62_v13  ;;  %1448 = vmatprep.subr.mxu1 %v1650_v0 }
  0x20   :  { %1391 = vmatmul.mubr.msk.f32.gmra.mxu0 %vm73_vm1, %v63_v14 }
  0x21   :  { %1401 = vmatprep.mubr.msk.f32.mxu0 %vm1651_vm0, %v1650_v0 }
  0x24   :  { %1402 = vmatmul.mubr.f32.vlgmr.msra.gmra.mxu0 %v1650_v0 }
  0x25   :  { %1405 = vmatpush3.msra.mxu0 %v1739_v4  ;;  %1412 = vmatprep.mubr.msk.f32.mxu0 %vm1651_vm0, %v1650_v0 }
  0x26   :  { %1406 = vmatprep.subr.mxu0 %v1650_v0 }
  0x27   :  { %1407 = vmatpush3.msra.mxu0 %v1751_v7 }
  0x28   :  { %1408 = vmatprep.subr.mxu0 %v1650_v0 }
  0x29   :  { %1409 = vmatpush3.msra.mxu0 %v1769_v10 }
  0x2a   :  { %1410 = vmatprep.subr.mxu0 %v1650_v0 }
  0x2b   :  { %1411 = vmatpush3.msra.mxu0 %v1779_v11 }
  0x2c   :  { %1415 = vmatprep.subr.mxu0 %v1650_v0 }
  0xd4   :  { %v1383_v16 = vpop.f32.mrf.mxu0 }
  0xd5   :  { %v170_v17 = vadd.f32 %v1383_v16, %v1274_v15 }
  0xd6   :  { %v164_v18 = vpop.f32.mrf.mxu0 }
  0xd7   :  { %v165_v30 = vadd.f32 %v1274_v15, %v164_v18 }
  0xd8   :  { %v1386_v19 = vpop.f32.mrf.mxu0 }
  0xd9   :  { %v1817_v20 = vadd.f32 %v1386_v19, %v1274_v15 }
  0xda   :  { %v174_v21 = vpop.f32.mrf.mxu0 }
  0xdb   :  { %v1819_v22 = vadd.f32 %v1274_v15, %v174_v21 }
  0xdc   :  { %v1389_v23 = vpop.f32.mrf.mxu0 }
  0xdd   :  { %v1821_v24 = vadd.f32 %v1389_v23, %v1274_v15 }
  0xde   :  { %v184_v25 = vpop.f32.mrf.mxu0 }
  0xdf   :  { %v1823_v26 = vadd.f32 %v1274_v15, %v184_v25 }
  0xe0   :  { %v1392_v27 = vpop.f32.mrf.mxu0 }
  0xe1   :  { %v1825_v28 = vadd.f32 %v1392_v27, %v1274_v15 }
  0xe2   :  { %v194_v29 = vpop.f32.mrf.mxu0 }
  0xe3   :  { %v1827_v31 = vadd.f32 %v1274_v15, %v194_v29 }
  0xe4   :  { %v277_v32 = vpop.f32.mrf.mxu0 }
  0xe5   :  { %v281_v33 = vadd.f32 %v277_v32, %v165_v30 }
  0xe6   :  { %v1403_v34 = vpop.f32.mrf.mxu0 }
  0xe7   :  { %1535 = vtanh.f32 %v281_v33  ;;  %v1283_v36 = vmul.f32 -1.442695, %v281_v33 }
  0xe9   :  { %1537 = vpow2.f32 %v1283_v36 }
  0xf4   :  { %v1536_v35 = vpop.eup %1535 }
  0xf5   :  { %291 = vrot.lane.b32.xlu0 %v1536_v35, %s1652_s3 }
  0xf6   :  { %v1538_v37 = vpop.eup %1537 }
  0xf7   :  { %v285_v38 = vadd.f32 1.0, %v1538_v37 }
  0xf9   :  { %1539 = vrcp.f32 %v285_v38 }
 0x106   :  { %v1540_v39 = vpop.eup %1539 }
 0x107   :  { %v289_v42 = vmul.f32 0.0, %v1540_v39 }
 0x167   :  { %v292_v40 = vpop.permute.xlu0 %291 }
 0x168   :  { %v294_v41 = vmul.f32 %v1540_v39, %v292_v40 }
 0x16a   :  { %296 = vrot.lane.b32.xlu0 %v294_v41, %s1653_s17 }
 0x1dc   :  { %v297_v43 = vpop.permute.xlu0 %296 }
 0x1dd   :  { %v299_v44 = vadd.f32 %v297_v43, %v289_v42 }
 0x1df   :  { %1541 = vtanh.f32 %v299_v44 }
 0x1ec   :  { %v1542_v45 = vpop.eup %1541 }
 0x1ed   :  { %302 = vrot.lane.b32.xlu1 %v1542_v45, %s1652_s3 }
 0x25f   :  { %v303_v46 = vpop.permute.xlu1 %302 }
 0x260   :  { %v305_v47 = vmul.f32 %v1540_v39, %v303_v46 }
 0x262   :  { %307 = vrot.lane.b32.xlu1 %v305_v47, %s1653_s17 }
 0x2d4   :  { %v308_v48 = vpop.permute.xlu1 %307 }
 0x2d5   :  { %1413 = vmatmul.mubr.msk.f32.vlgmr.msra.gmra.mxu0 %vm207_vm2, %v308_v48 }
 0x2d6   :  { %1416 = vmatpush3.msra.mxu0 %v1739_v4  ;;  %1423 = vmatprep.mubr.msk.f32.mxu0 %vm1651_vm0, %v1650_v0 }
 0x2d7   :  { %1417 = vmatprep.subr.mxu0 %v1650_v0 }
 0x2d8   :  { %1418 = vmatpush3.msra.mxu0 %v1751_v7 }
 0x2d9   :  { %1419 = vmatprep.subr.mxu0 %v1650_v0 }
 0x2da   :  { %1420 = vmatpush3.msra.mxu0 %v1769_v10 }
 0x2db   :  { %1421 = vmatprep.subr.mxu0 %v1650_v0 }
 0x2dc   :  { %1422 = vmatpush3.msra.mxu0 %v1779_v11 }
 0x2dd   :  { %1437 = vmatprep.subr.mxu0 %v1650_v0 }
 0x395   :  { %v377_v49 = vpop.f32.mrf.mxu0 }
 0x396   :  { %v381_v50 = vadd.f32 %v377_v49, %v170_v17 }
 0x397   :  { %v1414_v51 = vpop.f32.mrf.mxu0 }
 0x398   :  { %1543 = vtanh.f32 %v381_v50  ;;  %v1285_v53 = vmul.f32 -1.442695, %v381_v50 }
 0x39a   :  { %1545 = vpow2.f32 %v1285_v53 }
 0x3a5   :  { %v1544_v52 = vpop.eup %1543 }
 0x3a6   :  { %391 = vrot.lane.b32.xlu0 %v1544_v52, %s1652_s3 }
 0x3a7   :  { %v1546_v54 = vpop.eup %1545 }
 0x3a8   :  { %v385_v55 = vadd.f32 1.0, %v1546_v54 }
 0x3aa   :  { %1547 = vrcp.f32 %v385_v55 }
 0x3b7   :  { %v1548_v56 = vpop.eup %1547 }
 0x3b8   :  { %v389_v59 = vmul.f32 %v1548_v56, %v299_v44 }
 0x418   :  { %v392_v57 = vpop.permute.xlu0 %391 }
 0x419   :  { %v394_v58 = vmul.f32 %v1548_v56, %v392_v57 }
 0x41b   :  { %396 = vrot.lane.b32.xlu1 %v394_v58, %s1653_s17 }
 0x48d   :  { %v397_v60 = vpop.permute.xlu1 %396 }
 0x48e   :  { %v399_v61 = vadd.f32 %v397_v60, %v389_v59 }
 0x490   :  { %1549 = vtanh.f32 %v399_v61 }
 0x49d   :  { %v1550_v62 = vpop.eup %1549 }
 0x49e   :  { %402 = vrot.lane.b32.xlu0 %v1550_v62, %s1652_s3 }
 0x510   :  { %v403_v63 = vpop.permute.xlu0 %402 }
 0x511   :  { %v405_v1 = vmul.f32 %v1548_v56, %v403_v63 }
 0x513   :  { %407 = vrot.lane.b32.xlu1 %v405_v1, %s1653_s17 }
 0x585   :  { %v408_v2 = vpop.permute.xlu1 %407 }
 0x586   :  { %1424 = vmatmul.mubr.msk.f32.vlgmr.msra.gmra.mxu0 %vm207_vm2, %v408_v2 }
 0x587   :  { %1438 = vmatpush3.msra.mxu0 %v1739_v4  ;;  %1445 = vmatprep.mubr.msk.f32.mxu0 %vm1651_vm0, %v1650_v0 }
 0x588   :  { %1439 = vmatprep.subr.mxu0 %v1650_v0 }
 0x589   :  { %1440 = vmatpush3.msra.mxu0 %v1751_v7 }
 0x58a   :  { %1441 = vmatprep.subr.mxu0 %v1650_v0 }
 0x58b   :  { %1442 = vmatpush3.msra.mxu0 %v1769_v10 }
 0x58c   :  { %1443 = vmatprep.subr.mxu0 %v1650_v0 }
 0x58d   :  { %1444 = vmatpush3.msra.mxu0 %v1779_v11 }
 0x58e   :  { %1459 = vmatprep.subr.mxu0 %v1650_v0 }
 0x646   :  { %v477_v3 = vpop.f32.mrf.mxu0 }
 0x647   :  { %v481_v5 = vadd.f32 %v477_v3, %v1819_v22 }
 0x648   :  { %v1425_v6 = vpop.f32.mrf.mxu0 }
 0x649   :  { %1551 = vtanh.f32 %v481_v5  ;;  %v1287_v9 = vmul.f32 -1.442695, %v481_v5 }
 0x64b   :  { %1553 = vpow2.f32 %v1287_v9 }
 0x656   :  { %v1552_v8 = vpop.eup %1551 }
 0x657   :  { %491 = vrot.lane.b32.xlu0 %v1552_v8, %s1652_s3 }
 0x658   :  { %v1554_v12 = vpop.eup %1553 }
 0x659   :  { %v485_v13 = vadd.f32 1.0, %v1554_v12 }
 0x65b   :  { %1555 = vrcp.f32 %v485_v13 }
 0x668   :  { %v1556_v14 = vpop.eup %1555 }
 0x669   :  { %v489_v17 = vmul.f32 %v1556_v14, %v399_v61 }
 0x6c9   :  { %v492_v15 = vpop.permute.xlu0 %491 }
 0x6ca   :  { %v494_v16 = vmul.f32 %v1556_v14, %v492_v15 }
 0x6cc   :  { %496 = vrot.lane.b32.xlu1 %v494_v16, %s1653_s17 }
 0x73e   :  { %v497_v18 = vpop.permute.xlu1 %496 }
 0x73f   :  { %v499_v19 = vadd.f32 %v497_v18, %v489_v17 }
 0x741   :  { %1557 = vtanh.f32 %v499_v19 }
 0x74e   :  { %v1558_v21 = vpop.eup %1557 }
 0x74f   :  { %502 = vrot.lane.b32.xlu0 %v1558_v21, %s1652_s3 }
 0x7c1   :  { %v503_v22 = vpop.permute.xlu0 %502 }
 0x7c2   :  { %v505_v23 = vmul.f32 %v1556_v14, %v503_v22 }
 0x7c4   :  { %507 = vrot.lane.b32.xlu1 %v505_v23, %s1653_s17 }
 0x836   :  { %v508_v25 = vpop.permute.xlu1 %507 }
 0x837   :  { %1435 = vmatmul.mubr.msk.f32.vlgmr.msra.gmra.mxu1 %vm207_vm2, %v508_v25 }
 0x838   :  { %1449 = vmatpush3.msra.mxu1 %v1739_v4  ;;  %1456 = vmatprep.mubr.msk.f32.mxu1 %vm1651_vm0, %v1650_v0 }
 0x839   :  { %1450 = vmatprep.subr.mxu1 %v1650_v0 }
 0x83a   :  { %1451 = vmatpush3.msra.mxu1 %v1751_v7 }
 0x83b   :  { %1452 = vmatprep.subr.mxu1 %v1650_v0 }
 0x83c   :  { %1453 = vmatpush3.msra.mxu1 %v1769_v10 }
 0x83d   :  { %1454 = vmatprep.subr.mxu1 %v1650_v0 }
 0x83e   :  { %1455 = vmatpush3.msra.mxu1 %v1779_v11 }
 0x83f   :  { %1470 = vmatprep.subr.mxu1 %v1650_v0 }
 0x8f7   :  { %v577_v27 = vpop.f32.mrf.mxu1 }
 0x8f8   :  { %v581_v29 = vadd.f32 %v577_v27, %v1817_v20 }
 0x8f9   :  { %v1436_v30 = vpop.f32.mrf.mxu1 }
 0x8fa   :  { %1559 = vtanh.f32 %v581_v29  ;;  %v1289_v33 = vmul.f32 -1.442695, %v581_v29 }
 0x8fc   :  { %1561 = vpow2.f32 %v1289_v33 }
 0x907   :  { %v1560_v32 = vpop.eup %1559 }
 0x908   :  { %591 = vrot.lane.b32.xlu0 %v1560_v32, %s1652_s3 }
 0x909   :  { %v1562_v34 = vpop.eup %1561 }
 0x90a   :  { %v585_v35 = vadd.f32 1.0, %v1562_v34 }
 0x90c   :  { %1563 = vrcp.f32 %v585_v35 }
 0x919   :  { %v1564_v36 = vpop.eup %1563 }
 0x91a   :  { %v589_v39 = vmul.f32 %v1564_v36, %v499_v19 }
 0x97a   :  { %v592_v37 = vpop.permute.xlu0 %591 }
 0x97b   :  { %v594_v38 = vmul.f32 %v1564_v36, %v592_v37 }
 0x97d   :  { %596 = vrot.lane.b32.xlu1 %v594_v38, %s1653_s17 }
 0x9ef   :  { %v597_v40 = vpop.permute.xlu1 %596 }
 0x9f0   :  { %v599_v41 = vadd.f32 %v597_v40, %v589_v39 }
 0x9f2   :  { %1565 = vtanh.f32 %v599_v41 }
 0x9ff   :  { %v1566_v20 = vpop.eup %1565 }
 0xa00   :  { %602 = vrot.lane.b32.xlu0 %v1566_v20, %s1652_s3 }
 0xa72   :  { %v603_v42 = vpop.permute.xlu0 %602 }
 0xa73   :  { %v605_v43 = vmul.f32 %v1564_v36, %v603_v42 }
 0xa75   :  { %607 = vrot.lane.b32.xlu1 %v605_v43, %s1653_s17 }
 0xae7   :  { %v608_v44 = vpop.permute.xlu1 %607 }
 0xae8   :  { %1446 = vmatmul.mubr.msk.f32.vlgmr.msra.gmra.mxu0 %vm207_vm2, %v608_v44 }
 0xae9   :  { %1460 = vmatpush3.msra.mxu0 %v1739_v4  ;;  %1467 = vmatprep.mubr.msk.f32.mxu0 %vm1651_vm0, %v1650_v0 }
 0xaea   :  { %1461 = vmatprep.subr.mxu0 %v1650_v0 }
 0xaeb   :  { %1462 = vmatpush3.msra.mxu0 %v1751_v7 }
 0xaec   :  { %1463 = vmatprep.subr.mxu0 %v1650_v0 }
 0xaed   :  { %1464 = vmatpush3.msra.mxu0 %v1769_v10 }
 0xaee   :  { %1465 = vmatprep.subr.mxu0 %v1650_v0 }
 0xaef   :  { %1466 = vmatpush3.msra.mxu0 %v1779_v11 }
 0xaf0   :  { %1481 = vmatprep.subr.mxu0 %v1650_v0 }
 0xba8   :  { %v677_v45 = vpop.f32.mrf.mxu0 }
 0xba9   :  { %v681_v46 = vadd.f32 %v677_v45, %v1823_v26 }
 0xbaa   :  { %v1447_v47 = vpop.f32.mrf.mxu0 }
 0xbab   :  { %1567 = vtanh.f32 %v681_v46  ;;  %v1291_v49 = vmul.f32 -1.442695, %v681_v46  ;;  %v1008_v47 = vld [vmem:[%s1984_s4 + $0x10] sm:$0xff] }
 0xbad   :  { %1569 = vpow2.f32 %v1291_v49  ;;  %v1006_v49 = vld [vmem:[%s1984_s4] sm:$0xff] }
 0xbb8   :  { %v1568_v48 = vpop.eup %1567 }
 0xbb9   :  { %691 = vrot.lane.b32.xlu0 %v1568_v48, %s1652_s3  ;;  %v1007_v48 = vld [vmem:[%s1984_s4 + $0x8] sm:$0xff] }
 0xbba   :  { %v1570_v50 = vpop.eup %1569 }
 0xbbb   :  { %v685_v51 = vadd.f32 1.0, %v1570_v50 }
 0xbbd   :  { %1571 = vrcp.f32 %v685_v51 }
 0xbca   :  { %v1572_v52 = vpop.eup %1571 }
 0xbcb   :  { %v689_v55 = vmul.f32 %v1572_v52, %v599_v41 }
 0xc2b   :  { %v692_v53 = vpop.permute.xlu0 %691 }
 0xc2c   :  { %v694_v54 = vmul.f32 %v1572_v52, %v692_v53 }
 0xc2e   :  { %696 = vrot.lane.b32.xlu1 %v694_v54, %s1653_s17  ;;  %v1144_v54 = vld [vmem:[#allocation2 + $0x78] sm:$0xff] }
 0xca0   :  { %v697_v56 = vpop.permute.xlu1 %696 }
 0xca1   :  { %v699_v57 = vadd.f32 %v697_v56, %v689_v55  ;;  %v1143_v55 = vld [vmem:[#allocation2 + $0x70] sm:$0xff]  ;;  %v1142_v56 = vld [vmem:[#allocation2 + $0x68] sm:$0xff] }
 0xca3   :  { %1573 = vtanh.f32 %v699_v57 }
 0xcb0   :  { %v1574_v26 = vpop.eup %1573 }
 0xcb1   :  { %702 = vrot.lane.b32.xlu0 %v1574_v26, %s1652_s3  ;;  %v1140_v26 = vld [vmem:[#allocation2 + $0x58] sm:$0xff] }
 0xd23   :  { %v703_v58 = vpop.permute.xlu0 %702 }
 0xd24   :  { %v705_v59 = vmul.f32 %v1572_v52, %v703_v58  ;;  %v1139_v58 = vld [vmem:[#allocation2 + $0x50] sm:$0xff] }
 0xd26   :  { %707 = vrot.lane.b32.xlu1 %v705_v59, %s1653_s17  ;;  %v1138_v59 = vld [vmem:[#allocation2 + $0x48] sm:$0xff] }
 0xd98   :  { %v708_v60 = vpop.permute.xlu1 %707 }
 0xd99   :  { %1457 = vmatmul.mubr.msk.f32.vlgmr.msra.gmra.mxu1 %vm207_vm2, %v708_v60  ;;  %v1137_v60 = vld [vmem:[#allocation2 + $0x40] sm:$0xff] }
 0xd9a   :  { %1471 = vmatpush3.msra.mxu1 %v1739_v4  ;;  %1478 = vmatprep.mubr.msk.f32.mxu1 %vm1651_vm0, %v1650_v0 }
 0xd9b   :  { %1472 = vmatprep.subr.mxu1 %v1650_v0 }
 0xd9c   :  { %1473 = vmatpush3.msra.mxu1 %v1751_v7 }
 0xd9d   :  { %1474 = vmatprep.subr.mxu1 %v1650_v0 }
 0xd9e   :  { %1475 = vmatpush3.msra.mxu1 %v1769_v10 }
 0xd9f   :  { %1476 = vmatprep.subr.mxu1 %v1650_v0 }
 0xda0   :  { %1477 = vmatpush3.msra.mxu1 %v1779_v11 }
 0xda1   :  { %1492 = vmatprep.subr.mxu1 %v1650_v0 }
 0xe59   :  { %v777_v61 = vpop.f32.mrf.mxu1 }
 0xe5a   :  { %v781_v4 = vadd.f32 %v777_v61, %v1821_v24  ;;  %v1136_v61 = vld [vmem:[#allocation2 + $0x38] sm:$0xff] }
 0xe5b   :  { %v1458_v62 = vpop.f32.mrf.mxu1 }
 0xe5c   :  { %1575 = vtanh.f32 %v781_v4  ;;  %v1293_v1 = vmul.f32 -1.442695, %v781_v4  ;;  %v1135_v4 = vld [vmem:[#allocation2 + $0x30] sm:$0xff]  ;;  %v1134_v62 = vld [vmem:[#allocation2 + $0x28] sm:$0xff] }
 0xe5e   :  { %1577 = vpow2.f32 %v1293_v1  ;;  %v1132_v1 = vld [vmem:[#allocation2 + $0x18] sm:$0xff] }
 0xe69   :  { %v1576_v63 = vpop.eup %1575 }
 0xe6a   :  { %791 = vrot.lane.b32.xlu0 %v1576_v63, %s1652_s3  ;;  %v1133_v63 = vld [vmem:[#allocation2 + $0x20] sm:$0xff] }
 0xe6b   :  { %v1578_v7 = vpop.eup %1577 }
 0xe6c   :  { %v785_v2 = vadd.f32 1.0, %v1578_v7  ;;  %v1131_v7 = vld [vmem:[#allocation2 + $0x10] sm:$0xff] }
 0xe6e   :  { %1579 = vrcp.f32 %v785_v2  ;;  %v1130_v2 = vld [vmem:[#allocation2 + $0x8] sm:$0xff] }
 0xe7b   :  { %v1580_v10 = vpop.eup %1579 }
 0xe7c   :  { %v789_v11 = vmul.f32 %v1580_v10, %v699_v57  ;;  %v1141_v57 = vld [vmem:[#allocation2 + $0x60] sm:$0xff] }
 0xedc   :  { %v792_v3 = vpop.permute.xlu0 %791 }
 0xedd   :  { %v794_v5 = vmul.f32 %v1580_v10, %v792_v3  ;;  %v1298_v3 = vld [vmem:[%s1985_s5] ss:$0 sm:$0xff] }
 0xedf   :  { %796 = vrot.lane.b32.xlu1 %v794_v5, %s1653_s17 }
 0xf51   :  { %v797_v6 = vpop.permute.xlu1 %796 }
 0xf52   :  { %v799_v8 = vadd.f32 %v797_v6, %v789_v11 }
 0xf54   :  { %1581 = vtanh.f32 %v799_v8 }
 0xf61   :  { %v1582_v24 = vpop.eup %1581 }
 0xf62   :  { %802 = vrot.lane.b32.xlu0 %v1582_v24, %s1652_s3 }
 0xfd4   :  { %v803_v9 = vpop.permute.xlu0 %802 }
 0xfd5   :  { %v805_v12 = vmul.f32 %v1580_v10, %v803_v9  ;;  %v1129_v10 = vld [vmem:[#allocation2] sm:$0xff] }
 0xfd7   :  { %807 = vrot.lane.b32.xlu1 %v805_v12, %s1653_s17 }
0x1049   :  { %v808_v13 = vpop.permute.xlu1 %807 }
0x104a   :  { %1468 = vmatmul.mubr.msk.f32.vlgmr.msra.gmra.mxu0 %vm207_vm2, %v808_v13 }
0x104b   :  { %1489 = vmatprep.mubr.msk.f32.mxu0 %vm1651_vm0, %v1650_v0 }
0x110a   :  { %v877_v14 = vpop.f32.mrf.mxu0 }
0x110b   :  { %v881_v15 = vadd.f32 %v877_v14, %v1827_v31 }
0x110c   :  { %v1469_v16 = vpop.f32.mrf.mxu0 }
0x110d   :  { %1583 = vtanh.f32 %v881_v15  ;;  %v1295_v18 = vmul.f32 -1.442695, %v881_v15 }
0x110f   :  { %1585 = vpow2.f32 %v1295_v18 }
0x111a   :  { %v1584_v17 = vpop.eup %1583 }
0x111b   :  { %891 = vrot.lane.b32.xlu0 %v1584_v17, %s1652_s3 }
0x111c   :  { %v1586_v19 = vpop.eup %1585 }
0x111d   :  { %v885_v21 = vadd.f32 1.0, %v1586_v19 }
0x111f   :  { %1587 = vrcp.f32 %v885_v21 }
0x112c   :  { %v1588_v22 = vpop.eup %1587 }
0x112d   :  { %v889_v27 = vmul.f32 %v1588_v22, %v799_v8 }
0x118d   :  { %v892_v23 = vpop.permute.xlu0 %891 }
0x118e   :  { %v894_v25 = vmul.f32 %v1588_v22, %v892_v23 }
0x1190   :  { %896 = vrot.lane.b32.xlu1 %v894_v25, %s1653_s17 }
0x1202   :  { %v897_v29 = vpop.permute.xlu1 %896 }
0x1203   :  { %v899_v30 = vadd.f32 %v897_v29, %v889_v27 }
0x1205   :  { %1589 = vtanh.f32 %v899_v30 }
0x1212   :  { %v1590_v31 = vpop.eup %1589 }
0x1213   :  { %902 = vrot.lane.b32.xlu0 %v1590_v31, %s1652_s3 }
0x1285   :  { %v903_v32 = vpop.permute.xlu0 %902 }
0x1286   :  { %v905_v33 = vmul.f32 %v1588_v22, %v903_v32  ;;  %v1301_v32 = vld [vmem:[%s1987_s7] ss:$0 sm:$0xff] }
0x1288   :  { %907 = vrot.lane.b32.xlu1 %v905_v33, %s1653_s17 }
0x12fa   :  { %v908_v34 = vpop.permute.xlu1 %907 }
0x12fb   :  { %1479 = vmatmul.mubr.msk.f32.vlgmr.msra.gmra.mxu1 %vm207_vm2, %v908_v34 }
0x12fc   :  { %1524 = vmatprep.mubr.msk.f32.mxu1 %vm1651_vm0, %v1650_v0  ;;  %1493 = vmatpush3.msra.mxu1 %v1144_v54 }
0x12fd   :  { %1494 = vmatprep.subr.mxu1 %v1650_v0 }
0x12fe   :  { %1495 = vmatpush3.msra.mxu1 %v1143_v55 }
0x12ff   :  { %1496 = vmatprep.subr.mxu1 %v1650_v0 }
0x1300   :  { %1497 = vmatpush3.msra.mxu1 %v1142_v56  ;;  %v1303_v56 = vld [vmem:[%s1990_s10] ss:$0 sm:$0xff] }
0x1301   :  { %1498 = vmatprep.subr.mxu1 %v1650_v0 }
0x1302   :  { %1499 = vmatpush3.msra.mxu1 %v1141_v57 }
0x1303   :  { %1500 = vmatprep.subr.mxu1 %v1650_v0 }
0x1304   :  { %1501 = vmatpush3.msra.mxu1 %v1140_v26  ;;  %v1304_v26 = vld [vmem:[%s1991_s11] ss:$0 sm:$0xff] }
0x1305   :  { %1502 = vmatprep.subr.mxu1 %v1650_v0 }
0x1306   :  { %1503 = vmatpush3.msra.mxu1 %v1139_v58 }
0x1307   :  { %1504 = vmatprep.subr.mxu1 %v1650_v0 }
0x1308   :  { %1505 = vmatpush3.msra.mxu1 %v1138_v59 }
0x1309   :  { %1506 = vmatprep.subr.mxu1 %v1650_v0 }
0x130a   :  { %1507 = vmatpush3.msra.mxu1 %v1137_v60 }
0x130b   :  { %1508 = vmatprep.subr.mxu1 %v1650_v0 }
0x130c   :  { %1509 = vmatpush3.msra.mxu1 %v1136_v61 }
0x130d   :  { %1510 = vmatprep.subr.mxu1 %v1650_v0 }
0x130e   :  { %1511 = vmatpush3.msra.mxu1 %v1135_v4 }
0x130f   :  { %1512 = vmatprep.subr.mxu1 %v1650_v0 }
0x1310   :  { %1513 = vmatpush3.msra.mxu1 %v1134_v62 }
0x1311   :  { %1514 = vmatprep.subr.mxu1 %v1650_v0 }
0x1312   :  { %1515 = vmatpush3.msra.mxu1 %v1133_v63 }
0x1313   :  { %1516 = vmatprep.subr.mxu1 %v1650_v0 }
0x1314   :  { %1517 = vmatpush3.msra.mxu1 %v1132_v1 }
0x1315   :  { %1518 = vmatprep.subr.mxu1 %v1650_v0 }
0x1316   :  { %1519 = vmatpush3.msra.mxu1 %v1131_v7 }
0x1317   :  { %1520 = vmatprep.subr.mxu1 %v1650_v0 }
0x1318   :  { %1521 = vmatpush3.msra.mxu1 %v1130_v2 }
0x1319   :  { %1522 = vmatprep.subr.mxu1 %v1650_v0 }
0x131a   :  { %1523 = vmatpush3.msra.mxu1 %v1129_v10 }
0x13bb   :  { %v977_v35 = vpop.f32.mrf.mxu1 }
0x13bc   :  { %v981_v36 = vadd.f32 %v977_v35, %v1825_v28  ;;  %v1009_v28 = vld [vmem:[%s1984_s4 + $0x18] sm:$0xff] }
0x13bd   :  { %v1480_v37 = vpop.f32.mrf.mxu1  ;;  %1482 = vmatpush3.msra.mxu0 %v1009_v28 }
0x13be   :  { %1591 = vtanh.f32 %v981_v36  ;;  %v1297_v39 = vmul.f32 -1.442695, %v981_v36  ;;  %1483 = vmatprep.subr.mxu0 %v1650_v0  ;;  %v1302_v36 = vld [vmem:[%s1989_s9] ss:$0 sm:$0xff] }
0x13bf   :  { %1484 = vmatpush3.msra.mxu0 %v1008_v47 }
0x13c0   :  { %1593 = vpow2.f32 %v1297_v39  ;;  %1485 = vmatprep.subr.mxu0 %v1650_v0 }
0x13c1   :  { %1486 = vmatpush3.msra.mxu0 %v1007_v48 }
0x13c2   :  { %1487 = vmatprep.subr.mxu0 %v1650_v0 }
0x13c3   :  { %1488 = vmatpush3.msra.mxu0 %v1006_v49 }
0x13cb   :  { %v1592_v38 = vpop.eup %1591 }
0x13cc   :  { %991 = vrot.lane.b32.xlu0 %v1592_v38, %s1652_s3 }
0x13cd   :  { %v1594_v40 = vpop.eup %1593 }
0x13ce   :  { %v985_v41 = vadd.f32 1.0, %v1594_v40 }
0x13d0   :  { %1595 = vrcp.f32 %v985_v41 }
0x13dd   :  { %v1596_v20 = vpop.eup %1595 }
0x13de   :  { %v989_v44 = vmul.f32 %v1596_v20, %v899_v30  ;;  %v1300_v30 = vld [vmem:[%s1986_s6] ss:$0 sm:$0xff] }
0x143e   :  { %v992_v42 = vpop.permute.xlu0 %991 }
0x143f   :  { %v994_v43 = vmul.f32 %v1596_v20, %v992_v42 }
0x1441   :  { %996 = vrot.lane.b32.xlu1 %v994_v43, %s1653_s17 }
0x14b3   :  { %v997_v45 = vpop.permute.xlu1 %996 }
0x14b4   :  { %v999_v46 = vadd.f32 %v997_v45, %v989_v44 }
0x14b6   :  { %1597 = vtanh.f32 %v999_v46 }
0x14c3   :  { %v1598_v50 = vpop.eup %1597 }
0x14c4   :  { %1002 = vrot.lane.b32.xlu0 %v1598_v50, %s1652_s3 }
0x1536   :  { %v1003_v51 = vpop.permute.xlu0 %1002 }
0x1537   :  { %v1005_v52 = vmul.f32 %v1596_v20, %v1003_v51 }
0x1539   :  { %1018 = vrot.lane.b32.xlu1 %v1005_v52, %s1653_s17 }
0x15ab   :  { %v1019_v53 = vpop.permute.xlu1 %1018 }
0x15ac   :  { %1490 = vmatmul.mubr.msk.f32.vlgmr.msra.gmra.mxu0 %vm207_vm2, %v1019_v53 }
0x166c   :  { %v1088_v5 = vpop.f32.mrf.mxu0 }
0x166d   :  { %v1089_v11 = vadd.f32 %v1298_v3, %v1088_v5 }
0x166e   :  { %v1491_v6 = vpop.f32.mrf.mxu0 }
0x166f   :  { %v1092_v8 = vrot.slane %v1089_v11, 4 }
0x1671   :  { %v1093_v24 = vadd.f32 %v1092_v8, %v1089_v11 }
0x1673   :  { %v1094_v9 = vrot.slane %v1093_v24, 2 }
0x1675   :  { %v1095_v12 = vadd.f32 %v1094_v9, %v1093_v24 }
0x1677   :  { %v1096_v13 = vrot.slane %v1095_v12, 1 }
0x1679   :  { %v1097_v14 = vadd.f32 %v1096_v13, %v1095_v12 }
0x167b   :  { %v1099_v15 = vmul.f32 0.125, %v1097_v14 }
0x167d   :  { %v1100_v16 = vsub.f32 %v1089_v11, %v1099_v15 }
0x167f   :  { %v1101_v17 = vmul.f32 %v1100_v16, %v1100_v16 }
0x1681   :  { %v1102_v18 = vrot.slane %v1101_v17, 4 }
0x1683   :  { %v1103_v19 = vadd.f32 %v1102_v18, %v1101_v17 }
0x1685   :  { %v1104_v0 = vrot.slane %v1103_v19, 2 }
0x1687   :  { %v1105_v21 = vadd.f32 %v1104_v0, %v1103_v19 }
0x1689   :  { %v1106_v22 = vrot.slane %v1105_v21, 1 }
0x168b   :  { %v1107_v23 = vadd.f32 %v1106_v22, %v1105_v21 }
0x168d   :  { %v1108_v25 = vmul.f32 0.125, %v1107_v23 }
0x168f   :  { %v1109_v27 = vadd.f32 1e-05, %v1108_v25 }
0x1691   :  { %1599 = vrsqrt.f32 %v1109_v27 }
0x169e   :  { %v1600_v29 = vpop.eup %1599 }
0x169f   :  { %v1111_v31 = vmul.f32 %v1600_v29, %v1100_v16 }
0x16a1   :  { %v1119_v33 = vmul.f32 %v1300_v30, %v1111_v31 }
0x16a3   :  { %v1127_v34 = vadd.f32 %v1301_v32, %v1119_v33 }
0x16a5   :  { %v1128_v35 = vmax.f32 %v1127_v34, 0.0 }
0x16a7   :  { %1525 = vmatmul.mubr.f32.vlgmr.msra.gmra.mxu1 %v1128_v35 }
0x1767   :  { %v1218_v37 = vpop.f32.mrf.mxu1 }
0x1768   :  { %v1219_v38 = vadd.f32 %v1302_v36, %v1218_v37 }
0x1769   :  { %v1526_v39 = vpop.f32.mrf.mxu1 }
0x176a   :  { %v1222_v40 = vrot.slane %v1219_v38, 4 }
0x176c   :  { %v1223_v41 = vadd.f32 %v1222_v40, %v1219_v38 }
0x176e   :  { %v1224_v20 = vrot.slane %v1223_v41, 2 }
0x1770   :  { %v1225_v42 = vadd.f32 %v1224_v20, %v1223_v41 }
0x1772   :  { %v1226_v43 = vrot.slane %v1225_v42, 1 }
0x1774   :  { %v1227_v44 = vadd.f32 %v1226_v43, %v1225_v42 }
0x1776   :  { %v1228_v45 = vmul.f32 0.125, %v1227_v44 }
0x1778   :  { %v1229_v46 = vsub.f32 %v1219_v38, %v1228_v45 }
0x177a   :  { %v1230_v28 = vmul.f32 %v1229_v46, %v1229_v46 }
0x177c   :  { %v1231_v47 = vrot.slane %v1230_v28, 4 }
0x177e   :  { %v1232_v48 = vadd.f32 %v1231_v47, %v1230_v28 }
0x1780   :  { %v1233_v49 = vrot.slane %v1232_v48, 2 }
0x1782   :  { %v1234_v50 = vadd.f32 %v1233_v49, %v1232_v48 }
0x1784   :  { %v1235_v51 = vrot.slane %v1234_v50, 1 }
0x1786   :  { %v1236_v52 = vadd.f32 %v1235_v51, %v1234_v50 }
0x1788   :  { %v1237_v53 = vmul.f32 0.125, %v1236_v52 }
0x178a   :  { %v1238_v54 = vadd.f32 1e-05, %v1237_v53 }
0x178c   :  { %1601 = vrsqrt.f32 %v1238_v54 }
0x1799   :  { %v1602_v55 = vpop.eup %1601 }
0x179a   :  { %v1240_v57 = vmul.f32 %v1602_v55, %v1229_v46 }
0x179c   :  { %v1248_v58 = vmul.f32 %v1303_v56, %v1240_v57 }
0x179e   :  { %v1256_v59 = vadd.f32 %v1304_v26, %v1248_v58 }
0x17a0   :  { %v1257_v60 = vmax.f32 %v1256_v59, 0.0 }
0x17a2   :  { %1258 = vst [vmem:[#allocation5] sm:$0xff] %v1257_v60 }
0x17a3   :  { %1634 = shalt.err (!%p1631_p9)
}
0x17a4   :  { %1268 = dma.vmem_to_hbm [thread:$0]  %s1266_s8, 128, %s1992_s12, [#allocation4]  }
0x17a5   :  { %1645 = dma.done.wait [#allocation4], 128  }
0x17a6   :  { %1646 = vsyncadd [#allocation4], 4294967168 }
0x17a7   :  { %1272 = vsyncpa [#allocation3], 1 }
0x17a8   :  { %1273 = vsyncpa [#allocation4], 1 }

</bundles_post_ra>
